<compile_context>
chip_gen: v5e
topology: v5e:2x2
jax: 0.10.0
libtpu: 0.0.40
codegen_flags: <defaults>
</compile_context>

<pallas_src>
import functools

import numpy as np
import jax
import jax.numpy as jnp
from jax import lax
from jax.experimental import pallas as pl
from jax.experimental.pallas import tpu as pltpu

_NEG_INF = -1e30


# ----------------------------------------------------------------------------
# Gaussian filter parameters (exactly Communication.init_gaussian_filter).
# The 2-D kernel is rank-1:  gk = outer(g1, g1)  with
#   g1[i] = sqrt(1/(2*pi*sigma)) * exp(-d_i^2 / (2*sigma^2))
# ----------------------------------------------------------------------------
def _gaussian_kernel_2d(k_size, sigma):
    center = k_size // 2
    x, y = np.mgrid[0 - center:k_size - center, 0 - center:k_size - center]
    gk = 1.0 / (2.0 * np.pi * sigma) * np.exp(
        -(np.square(x) + np.square(y)) / (2.0 * np.square(sigma)))
    return gk.astype(np.float32)


def _gaussian_kernel_1d(k_size, sigma):
    center = k_size // 2
    d = np.arange(k_size, dtype=np.float64) - center
    g1 = np.sqrt(1.0 / (2.0 * np.pi * sigma)) * np.exp(
        -np.square(d) / (2.0 * sigma ** 2))
    return g1.astype(np.float32)


# ----------------------------------------------------------------------------
# Kernel 1: Communication mask for one agent.
#   sigmoid(max over anchors) -> separable gaussian conv -> (> threshold).
# Halo is built inside VMEM scratch (no wrapper-side jnp.pad, no iota masking).
# grid = (N,); the ego-row forcing and the communication rate are handled
# downstream (rate must use the mask BEFORE forcing, like PyTorch).
# ----------------------------------------------------------------------------
def _comm_kernel(conf_ref, mask_ref, padw_ref, padh_ref,
                 *, H, W, k, pad, threshold, g1):
    conf = conf_ref[...].astype(jnp.float32)            # (A, H, W)
    # sigmoid is monotone -> reduce first, one sigmoid instead of A sigmoids
    m = jax.nn.sigmoid(jnp.max(conf, axis=0))           # (H, W)

    # horizontal (lane axis) pass with zero halo
    padw_ref[...] = jnp.zeros_like(padw_ref)            # (H, W + 2*pad)
    padw_ref[:, pad:pad + W] = m
    rowv = padw_ref[...]
    acc = float(g1[0]) * rowv[:, 0:W]
    for t in range(1, k):
        acc = acc + float(g1[t]) * rowv[:, t:t + W]

    # vertical (sublane axis) pass with zero halo
    padh_ref[...] = jnp.zeros_like(padh_ref)            # (H + 2*pad, W)
    padh_ref[pad:pad + H, :] = acc
    colv = padh_ref[...]
    sm = float(g1[0]) * colv[0:H, :]
    for t in range(1, k):
        sm = sm + float(g1[t]) * colv[t:t + H, :]

    mask_ref[...] = (sm > threshold).astype(mask_ref.dtype)


# ----------------------------------------------------------------------------
# Kernel 2: fused (x * communication_mask) + ego scaled-dot-product attention.
# Agents are streamed along the innermost ("arbitrary") grid axis with an
# online softmax; the ego agent (l == 0) is captured into a VMEM scratch at the
# first step and reused as the query.  Invalid (padded) agents get weight 0.
# ----------------------------------------------------------------------------
def _attn_fuse_kernel(off_ref, rl_ref, x_ref, cm_ref, out_ref,
                      q_sc, m_sc, s_sc, acc_sc, *, C):
    l = pl.program_id(2)
    n_valid = rl_ref[pl.program_id(0)]

    feat = x_ref[...].astype(jnp.float32)                # (C, TILE_P)
    cmask = cm_ref[...].astype(jnp.float32)              # (1, TILE_P)
    cmask = jnp.where(l == 0, 1.0, cmask)                # ego mask forced to 1
    feat = feat * cmask

    @pl.when(l == 0)
    def _():
        q_sc[...] = feat                                  # ego (query) features
        m_sc[...] = jnp.full_like(m_sc, _NEG_INF)
        s_sc[...] = jnp.zeros_like(s_sc)
        acc_sc[...] = jnp.zeros_like(acc_sc)

    score = jnp.sum(q_sc[...] * feat, axis=0, keepdims=True) \
        * (1.0 / float(np.sqrt(C)))                       # (1, TILE_P)
    score = jnp.where(l < n_valid, score, _NEG_INF)       # padded agent -> 0 wt

    m_new = jnp.maximum(m_sc[...], score)
    alpha = jnp.exp(m_sc[...] - m_new)
    p = jnp.exp(score - m_new)
    s_sc[...] = alpha * s_sc[...] + p
    acc_sc[...] = alpha * acc_sc[...] + p * feat
    m_sc[...] = m_new

    @pl.when(l == pl.num_programs(2) - 1)
    def _():
        out_ref[...] = (acc_sc[...] *
                        pl.reciprocal(s_sc[...], approx=False)
                        ).astype(out_ref.dtype)


def _pick_tile_p(P, max_tile=1024):
    """Largest multiple of 128 (<= max_tile) that divides P, else whole P."""
    for mult in range(max_tile // 128, 0, -1):
        t = 128 * mult
        if P % t == 0:
            return t
    return P


# ----------------------------------------------------------------------------
# Where2comm wrapper (plain-JAX glue: offsets, free reshapes, rate reduction)
# ----------------------------------------------------------------------------
class Where2commPallas:
    def __init__(self, args):
        self.discrete_ratio = args['voxel_size'][0]
        self.downsample_rate = args['downsample_rate']
        self.fully = args['fully']
        self.multi_scale = args['multi_scale']
        self.in_channels = args['in_channels']
        comm = args['communication']
        self.threshold = comm['threshold']
        self.smooth = 'gaussian_smooth' in comm
        if self.smooth:
            self.k_size = comm['gaussian_smooth']['k_size']
            self.g1 = _gaussian_kernel_1d(self.k_size,
                                          comm['gaussian_smooth']['c_sigma'])
        else:
            self.k_size = 1                    # identity "filter"
            self.g1 = np.ones((1,), np.float32)

    def _communication(self, psm_single):
        N, A, H, W = psm_single.shape
        pad = (self.k_size - 1) // 2
        kern = functools.partial(
            _comm_kernel, H=H, W=W, k=self.k_size, pad=pad,
            threshold=float(self.threshold), g1=self.g1)
        return pl.pallas_call(
            kern,
            out_shape=jax.ShapeDtypeStruct((N, H, W), jnp.float32),
            grid=(N,),
            in_specs=[pl.BlockSpec((None, A, H, W), lambda n: (n, 0, 0, 0))],
            out_specs=pl.BlockSpec((None, H, W), lambda n: (n, 0, 0)),
            scratch_shapes=[pltpu.VMEM((H, W + 2 * pad), jnp.float32),
                            pltpu.VMEM((H + 2 * pad, W), jnp.float32)],
            compiler_params=pltpu.CompilerParams(
                dimension_semantics=("parallel",)),
        )(psm_single)

    def forward(self, x, psm_single, record_len, pairwise_t_matrix):
        N, C, H, W = x.shape
        B = pairwise_t_matrix.shape[0]
        P = H * W
        rl_np = np.asarray(record_len, dtype=np.int64)
        off_np = np.concatenate([[0], np.cumsum(rl_np)[:-1]]).astype(np.int32)
        Lmax = int(rl_np.max())

        if self.fully:
            comm_rate = jnp.float32(1.0)
            comm_masks = jnp.ones((N, H, W), jnp.float32)
        else:
            if self.threshold:
                comm_masks = self._communication(psm_single)       # (N, H, W)
            else:
                comm_masks = jnp.ones((N, H, W), jnp.float32)
            # communication rate, computed BEFORE the ego row is forced to 1
            # (matches the PyTorch module); tiny reduction, done in plain JAX.
            rates = []
            for b in range(B):
                lo, lb = int(off_np[b]), int(rl_np[b])
                rates.append(jnp.sum(comm_masks[lo:lo + lb]) / float(lb * H * W))
            comm_rate = sum(rates) / B

        # -------- fused mask-multiply + ego attention fusion ----------------
        TILE_P = _pick_tile_p(P)
        x3 = x.reshape(N, C, P)                            # free, lane-dense P
        cm3 = comm_masks.reshape(N, 1, P).astype(x.dtype)  # free reshape
        offsets = jnp.asarray(off_np, jnp.int32)
        rl = jnp.asarray(rl_np, jnp.int32)

        # agent index = batch offset + min(l, L_b - 1)   (clamp: no OOB DMA;
        # the clamped duplicate gets softmax weight 0 inside the kernel)
        kv_map = lambda b, p, l, off_r, rl_r: (
            off_r[b] + jnp.minimum(l, rl_r[b] - 1), 0, p)

        out = pl.pallas_call(
            functools.partial(_attn_fuse_kernel, C=C),
            out_shape=jax.ShapeDtypeStruct((B, C, P), x.dtype),
            grid_spec=pltpu.PrefetchScalarGridSpec(
                num_scalar_prefetch=2,
                grid=(B, P // TILE_P, Lmax),
                in_specs=[pl.BlockSpec((None, C, TILE_P), kv_map),
                          pl.BlockSpec((None, 1, TILE_P), kv_map)],
                out_specs=pl.BlockSpec(
                    (None, C, TILE_P),
                    lambda b, p, l, off_r, rl_r: (b, 0, p)),
                scratch_shapes=[pltpu.VMEM((C, TILE_P), jnp.float32),  # q
                                pltpu.VMEM((1, TILE_P), jnp.float32),  # m
                                pltpu.VMEM((1, TILE_P), jnp.float32),  # sum
                                pltpu.VMEM((C, TILE_P), jnp.float32)]),  # acc
            compiler_params=pltpu.CompilerParams(
                dimension_semantics=("parallel", "parallel", "arbitrary")),
        )(offsets, rl, x3, cm3)

        return out.reshape(B, C, H, W), comm_rate


# ----------------------------------------------------------------------------
# Pure-JAX reference (mirrors the PyTorch semantics) for verification.
# ----------------------------------------------------------------------------
def reference_forward(x, psm, record_len, B, gk, thr):
    N, C, H, W = x.shape
    pad = (gk.shape[0] - 1) // 2
    offsets = np.concatenate([[0], np.cumsum(record_len)]).astype(int)
    w = jnp.asarray(gk)[None, None]
    masks, rates = [], []
    for b in range(B):
        conf = psm[offsets[b]:offsets[b + 1]]
        L = conf.shape[0]
        m = jnp.max(jax.nn.sigmoid(conf), axis=1, keepdims=True)
        sm = lax.conv_general_dilated(m, w, (1, 1), [(pad, pad), (pad, pad)])
        mask = (sm > thr).astype(jnp.float32)
        rates.append(jnp.sum(mask) / (L * H * W))
        mask = mask.at[0].set(1.0)
        masks.append(mask)
    comm_rate = sum(rates) / B
    x = x * jnp.concatenate(masks, axis=0)
    outs = []
    for b in range(B):
        feat = x[offsets[b]:offsets[b + 1]].reshape(-1, C, H * W).transpose(2, 0, 1)
        score = jnp.einsum('pic,pjc->pij', feat, feat) / np.sqrt(C)
        attn = jax.nn.softmax(score, axis=-1)
        ctx = jnp.einsum('pij,pjc->pic', attn, feat)
        outs.append(ctx.transpose(1, 2, 0).reshape(-1, C, H, W)[0])
    return jnp.stack(outs), comm_rate


if __name__ == "__main__":
    args = {
        'voxel_size': [0.4, 0.4, 4],
        'downsample_rate': 4,
        'fully': False,
        'multi_scale': False,
        'in_channels': 8,
        'communication': {
            'threshold': 0.01,
            'gaussian_smooth': {'k_size': 5, 'c_sigma': 1.0},
        },
    }

    key = jax.random.PRNGKey(0)
    k1, k2, k3 = jax.random.split(key, 3)

    record_len = [2, 3]                 # two samples: 2 CAVs and 3 CAVs
    B = len(record_len)
    N = sum(record_len)
    C, H, W, A, Lt = 8, 16, 128, 2, 5   # P = 2048 -> TILE_P = 1024 (2 tiles)

    x = jax.random.normal(k1, (N, C, H, W), jnp.float32)
    psm_single = jax.random.normal(k2, (N, A, H, W), jnp.float32)
    pairwise_t_matrix = jax.random.normal(k3, (B, Lt, Lt, 4, 4), jnp.float32)

    model = Where2commPallas(args)
    x_fuse, comm_rate = model.forward(x, psm_single, record_len, pairwise_t_matrix)
    jax.block_until_ready((x_fuse, comm_rate))

    x_ref, rate_ref = reference_forward(
        x, psm_single, record_len, B, _gaussian_kernel_2d(5, 1.0),
        args['communication']['threshold'])
    np.testing.assert_allclose(np.asarray(x_fuse), np.asarray(x_ref),
                               rtol=1e-4, atol=1e-4)
    np.testing.assert_allclose(float(comm_rate), float(rate_ref),
                               rtol=1e-5, atol=1e-5)

    print("KERNEL_OK")
</pallas_src>

<mosaic_0001>
module attributes {stable_mosaic.version = 11 : i64} {
  func.func @_comm_kernel(%arg0: i32, %arg1: memref<1x2x16x128xf32, #tpu.memory_space<vmem>>, %arg2: memref<1x16x128xf32, #tpu.memory_space<vmem>>, %arg3: memref<16x132xf32, #tpu.memory_space<vmem>>, %arg4: memref<20x128xf32, #tpu.memory_space<vmem>>) attributes {dimension_semantics = [#tpu.dimension_semantics<parallel>], iteration_bounds = array<i64: 5>, scalar_prefetch = 0 : i64, scratch_operands = 2 : i64, tpu.core_type = #tpu.core_type<tc>, window_params = [{transform_indices = @transform_0, window_bounds = array<i64: 1, 2, 16, 128>}, {transform_indices = @transform_1, window_bounds = array<i64: 1, 16, 128>}]} {
    %c0 = arith.constant 0 : index
    %c0_0 = arith.constant 0 : index
    %c0_1 = arith.constant 0 : index
    %c0_2 = arith.constant 0 : index
    %0 = vector.load %arg1[%c0, %c0_0, %c0_1, %c0_2] : memref<1x2x16x128xf32, #tpu.memory_space<vmem>>, vector<1x2x16x128xf32>
    %1 = vector.shape_cast %0 : vector<1x2x16x128xf32> to vector<2x16x128xf32>
    %cst = arith.constant dense<0xFF800000> : vector<16x128xf32>
    %2 = vector.multi_reduction <maximumf>, %1, %cst [0] : vector<2x16x128xf32> to vector<16x128xf32>
    %3 = arith.negf %2 : vector<16x128xf32>
    %4 = math.exp %3 : vector<16x128xf32>
    %cst_3 = arith.constant 1.000000e+00 : f32
    %5 = vector.broadcast %cst_3 : f32 to vector<16x128xf32>
    %6 = arith.addf %5, %4 : vector<16x128xf32>
    %7 = arith.divf %5, %6 : vector<16x128xf32>
    %cst_4 = arith.constant 0.000000e+00 : f32
    %8 = vector.broadcast %cst_4 : f32 to vector<16x132xf32>
    %c0_5 = arith.constant 0 : index
    %c0_6 = arith.constant 0 : index
    %9 = vector.load %arg3[%c0_5, %c0_6] : memref<16x132xf32, #tpu.memory_space<vmem>>, vector<16x132xf32>
    tpu.vector_store %arg3[%c0_5, %c0_6], %8 {strides = array<i32>} : memref<16x132xf32, #tpu.memory_space<vmem>>, vector<16x132xf32>,
    %c0_7 = arith.constant 0 : index
    %c2 = arith.constant 2 : index
    %10 = vector.load %arg3[%c0_7, %c2] : memref<16x132xf32, #tpu.memory_space<vmem>>, vector<16x128xf32>
    tpu.vector_store %arg3[%c0_7, %c2], %7 {strides = array<i32>} : memref<16x132xf32, #tpu.memory_space<vmem>>, vector<16x128xf32>,
    %c0_8 = arith.constant 0 : index
    %c0_9 = arith.constant 0 : index
    %11 = vector.load %arg3[%c0_8, %c0_9] : memref<16x132xf32, #tpu.memory_space<vmem>>, vector<16x132xf32>
    %12 = vector.extract_strided_slice %11 {offsets = [0, 0], sizes = [16, 128], strides = [1, 1]} : vector<16x132xf32> to vector<16x128xf32>
    %cst_10 = arith.constant 0.0539909676 : f32
    %13 = vector.broadcast %cst_10 : f32 to vector<16x128xf32>
    %14 = arith.mulf %13, %12 : vector<16x128xf32>
    %15 = vector.extract_strided_slice %11 {offsets = [0, 1], sizes = [16, 128], strides = [1, 1]} : vector<16x132xf32> to vector<16x128xf32>
    %cst_11 = arith.constant 0.241970718 : f32
    %16 = vector.broadcast %cst_11 : f32 to vector<16x128xf32>
    %17 = arith.mulf %16, %15 : vector<16x128xf32>
    %18 = arith.addf %14, %17 : vector<16x128xf32>
    %19 = vector.extract_strided_slice %11 {offsets = [0, 2], sizes = [16, 128], strides = [1, 1]} : vector<16x132xf32> to vector<16x128xf32>
    %cst_12 = arith.constant 0.398942292 : f32
    %20 = vector.broadcast %cst_12 : f32 to vector<16x128xf32>
    %21 = arith.mulf %20, %19 : vector<16x128xf32>
    %22 = arith.addf %18, %21 : vector<16x128xf32>
    %23 = vector.extract_strided_slice %11 {offsets = [0, 3], sizes = [16, 128], strides = [1, 1]} : vector<16x132xf32> to vector<16x128xf32>
    %cst_13 = arith.constant 0.241970718 : f32
    %24 = vector.broadcast %cst_13 : f32 to vector<16x128xf32>
    %25 = arith.mulf %24, %23 : vector<16x128xf32>
    %26 = arith.addf %22, %25 : vector<16x128xf32>
    %27 = vector.extract_strided_slice %11 {offsets = [0, 4], sizes = [16, 128], strides = [1, 1]} : vector<16x132xf32> to vector<16x128xf32>
    %cst_14 = arith.constant 0.0539909676 : f32
    %28 = vector.broadcast %cst_14 : f32 to vector<16x128xf32>
    %29 = arith.mulf %28, %27 : vector<16x128xf32>
    %30 = arith.addf %26, %29 : vector<16x128xf32>
    %cst_15 = arith.constant 0.000000e+00 : f32
    %31 = vector.broadcast %cst_15 : f32 to vector<20x128xf32>
    %c0_16 = arith.constant 0 : index
    %c0_17 = arith.constant 0 : index
    %32 = vector.load %arg4[%c0_16, %c0_17] : memref<20x128xf32, #tpu.memory_space<vmem>>, vector<20x128xf32>
    tpu.vector_store %arg4[%c0_16, %c0_17], %31 {strides = array<i32>} : memref<20x128xf32, #tpu.memory_space<vmem>>, vector<20x128xf32>,
    %c2_18 = arith.constant 2 : index
    %c0_19 = arith.constant 0 : index
    %33 = vector.load %arg4[%c2_18, %c0_19] : memref<20x128xf32, #tpu.memory_space<vmem>>, vector<16x128xf32>
    tpu.vector_store %arg4[%c2_18, %c0_19], %30 {strides = array<i32>} : memref<20x128xf32, #tpu.memory_space<vmem>>, vector<16x128xf32>,
    %c0_20 = arith.constant 0 : index
    %c0_21 = arith.constant 0 : index
    %34 = vector.load %arg4[%c0_20, %c0_21] : memref<20x128xf32, #tpu.memory_space<vmem>>, vector<20x128xf32>
    %35 = vector.extract_strided_slice %34 {offsets = [0, 0], sizes = [16, 128], strides = [1, 1]} : vector<20x128xf32> to vector<16x128xf32>
    %cst_22 = arith.constant 0.0539909676 : f32
    %36 = vector.broadcast %cst_22 : f32 to vector<16x128xf32>
    %37 = arith.mulf %36, %35 : vector<16x128xf32>
    %38 = vector.extract_strided_slice %34 {offsets = [1, 0], sizes = [16, 128], strides = [1, 1]} : vector<20x128xf32> to vector<16x128xf32>
    %cst_23 = arith.constant 0.241970718 : f32
    %39 = vector.broadcast %cst_23 : f32 to vector<16x128xf32>
    %40 = arith.mulf %39, %38 : vector<16x128xf32>
    %41 = arith.addf %37, %40 : vector<16x128xf32>
    %42 = vector.extract_strided_slice %34 {offsets = [2, 0], sizes = [16, 128], strides = [1, 1]} : vector<20x128xf32> to vector<16x128xf32>
    %cst_24 = arith.constant 0.398942292 : f32
    %43 = vector.broadcast %cst_24 : f32 to vector<16x128xf32>
    %44 = arith.mulf %43, %42 : vector<16x128xf32>
    %45 = arith.addf %41, %44 : vector<16x128xf32>
    %46 = vector.extract_strided_slice %34 {offsets = [3, 0], sizes = [16, 128], strides = [1, 1]} : vector<20x128xf32> to vector<16x128xf32>
    %cst_25 = arith.constant 0.241970718 : f32
    %47 = vector.broadcast %cst_25 : f32 to vector<16x128xf32>
    %48 = arith.mulf %47, %46 : vector<16x128xf32>
    %49 = arith.addf %45, %48 : vector<16x128xf32>
    %50 = vector.extract_strided_slice %34 {offsets = [4, 0], sizes = [16, 128], strides = [1, 1]} : vector<20x128xf32> to vector<16x128xf32>
    %cst_26 = arith.constant 0.0539909676 : f32
    %51 = vector.broadcast %cst_26 : f32 to vector<16x128xf32>
    %52 = arith.mulf %51, %50 : vector<16x128xf32>
    %53 = arith.addf %49, %52 : vector<16x128xf32>
    %cst_27 = arith.constant 0.00999999977 : f32
    %54 = vector.broadcast %cst_27 : f32 to vector<16x128xf32>
    %55 = arith.cmpf ogt, %53, %54 : vector<16x128xf32>
    %56 = arith.extui %55 : vector<16x128xi1> to vector<16x128xi32>
    %57 = arith.sitofp %56 : vector<16x128xi32> to vector<16x128xf32>
    %c0_28 = arith.constant 0 : index
    %c0_29 = arith.constant 0 : index
    %c0_30 = arith.constant 0 : index
    %58 = vector.load %arg2[%c0_28, %c0_29, %c0_30] : memref<1x16x128xf32, #tpu.memory_space<vmem>>, vector<1x16x128xf32>
    %59 = vector.shape_cast %58 : vector<1x16x128xf32> to vector<16x128xf32>
    %60 = vector.shape_cast %57 : vector<16x128xf32> to vector<1x16x128xf32>
    tpu.vector_store %arg2[%c0_28, %c0_29, %c0_30], %60 {strides = array<i32>} : memref<1x16x128xf32, #tpu.memory_space<vmem>>, vector<1x16x128xf32>,
    return
  }
  func.func @transform_0(%arg0: i32) -> (i32, i32, i32, i32) {
    %c0_i32 = arith.constant 0 : i32
    %c0_i32_0 = arith.constant 0 : i32
    %c0_i32_1 = arith.constant 0 : i32
    %c0_i32_2 = arith.constant 0 : i32
    return %arg0, %c0_i32, %c0_i32_0, %c0_i32_1 : i32, i32, i32, i32
  }
  func.func @transform_1(%arg0: i32) -> (i32, i32, i32) {
    %c0_i32 = arith.constant 0 : i32
    %c0_i32_0 = arith.constant 0 : i32
    %c0_i32_1 = arith.constant 0 : i32
    return %arg0, %c0_i32, %c0_i32_0 : i32, i32, i32
  }
}

</mosaic_0001>

<bundles_post_ra>
// kernel: tpu_custom_call.1
= control target key start
LH: loop header
LB: loop body
LE: loop exit
PB: predicated region body
PF: predicated region fallthrough
CT: control target
= control target key end

     0   :  { %6 = vsyncpa [#allocation5], 0  ;;  %s796_s0 = inlined_call_operand.hbm [shape: f32[5,2,16,128], index: 0, kind: input, shape index: {}]   ;;  %s797_s1 = inlined_call_operand.hbm [shape: f32[5,16,128], index: 1, kind: output, shape index: {}]  }
   0x1   :  { %8 = vsyncpa [#allocation5 + $0x1], 0 }
   0x2   :  { %9 = vsyncpa [#allocation6], 0 }
   0x3   :  { %11 = vsyncpa [#allocation6 + $0x1], 0  ;;  %s653_s6 = smov 0   ;;  %s655_s7 = smov 0  }
   0x4   :  { %s657_s8 = smov 0   ;;  %s659_s9 = smov 0  }
   0x5 LB: > { %s674_s10 = sadd.s32 4294967295, %s631_s9   ;;  %s451_s11 = sadd.s32 4294967294, %s631_s9   ;;  %s631_s9 = sphi %s659_s9, %s806_s9   ;;  %s627_s8 = sphi %s657_s8, %s805_s8   ;;  %s623_s7 = sphi %s655_s7, %s804_s7   ;;  %s619_s6 = sphi %s653_s6, %s803_s6  }
   0x6   : > { %s678_s12 = sadd.s32 1, %s631_s9   ;;  %s24_s13 = sadd.s32 1, %s627_s8 }
   0x7   : > { %s21_s14 = ssub.s32 %s631_s9, %s678_s12  ;;  %p31_p0 = scmp.ne.s32.totalorder %s627_s8, %s623_s7 }
   0x8   : > { %p22_p1 = scmp.eq.s32.totalorder %s21_s14, 0  ;;  %p32_p2 = scmp.eq.s32.totalorder %s631_s9, 0 }
   0x9   : > { %p37_p3 = scmp.ne.s32.totalorder %s623_s7, %s619_s6  ;;  %p38_p4 = scmp.eq.s32.totalorder %s674_s10, 0 }
   0xa   : > { %s690_s15 = scalar_select %p22_p1, %s627_s8, %s24_s13  }
   0xb   : > { %p692_p5 = por %p32_p2, %p31_p0  ;;  %p696_p6 = por %p38_p4, %p37_p3 }
   0xc   : > { %p61_p7 = scmp.eq.s32.totalorder %s674_s10, 4  ;;  %p67_p8 = scmp.eq.s32.totalorder %s451_s11, 4 }
   0xd   : > { %p483_p9 = scmp.lt.s32.totalorder %s631_s9, 5  ;;  %s87_s20 = sand.u32 1, %s627_s8  }
   0xe   : > { %p702_p10 = por %p61_p7, %p31_p0  ;;  %p706_p11 = por %p67_p8, %p37_p3 }
   0xf   : > { %s469_s21 = sshll.u32 %s631_s9, 5  ;;  %s454_s22 = sshll.u32 %s87_s20, 5 }
  0x10   : > { %s96_s25 = scalar_lea.hbm %s796_s0, %s469_s21  ;;  %s91_s27 = scalar_lea.vmem [#allocation4], %s454_s22 }
  0x11   : > { %s97_s26 = sshll.u32 %s96_s25, 4  ;;  %s99_s28 = sshll.u32 %s91_s27, 4  ;;  %s98_s26 = int_to_ptr.hbm [resolvable:$true] %s97_s26  ;;  %s100_s28 = int_to_ptr.vmem [resolvable:$true] %s99_s28 }
  0x12   : > { %p717_p12 = pnand %p483_p9, %p692_p5  ;;  %p457_p13 = scmp.ge.s32.totalorder %s631_s9, 1 }
  0x13   : > { %p107_p0 = scmp.lt.s32.totalorder %s631_s9, 6  ;;  %s88_s30 = scalar_lea.sflag [#allocation5], %s87_s20 }
  0x14   : > { %s535_s2 = sshra.s32 %s98_s26, 4  ;;  %p539_p2 = pneg %p717_p12  ;;  %s536_s2 = int_to_ptr.hbm [resolvable:$true] %s535_s2 }
  0x15   : > { %s537_s3 = scalar_lea.hbm %s536_s2, 32  ;;  %s542_s11 = scalar_lea.hbm %s796_s0, 160 }
  0x16   : > { %p538_p1 = scmp.ne.s32.totalorder %s536_s2, %s537_s3  ;;  %p543_p5 = scmp.lt.s32.totalorder %s536_s2, %s796_s0 }
  0x17   : > { %p544_p7 = scmp.lt.s32.totalorder %s542_s11, %s537_s3 }
  0x18   : > { %p540_p3 = pnand %p539_p2, %p538_p1 }
  0x19   : > { %p545_p8 = por %p544_p7, %p543_p5 }
  0x1a   : > { %p541_p4 = pneg %p540_p3 }
  0x1c   : > { %p546_p9 = pnand %p545_p8, %p541_p4 }
  0x1e   : > { %549 = shalt.err (!%p546_p9)
}
  0x1f   : > { %s633_s16 = smov 128   ;;  %s634_s20 = smov 8  }
  0x20   : > { %478 = dma.hbm_to_vmem [thread:$0]  (!%p717_p12), %s98_s26, 512, %s100_s28, %s88_s30, %s633_s16, %s633_s16, %s634_s20  }
  0x21   : > { %p108_p1 = pnand %p457_p13, %p107_p0 }
  0x22   : > { %s738_s21 = sand.u32 (!%p108_p1), 1, %s623_s7  }
  0x23   : > { %111 = sbr.rel (%p108_p1) target bundleno = 383 (0x17f), region = 24  ;;  %s458_s22 = sshll.u32 (!%p108_p1), %s738_s21, 5 }
  0x24   : > { %s114_s23 = scalar_lea.sflag (!%p108_p1), [#allocation5], %s738_s21  ;;  %s117_s24 = scalar_lea.vmem (!%p108_p1), [#allocation4], %s458_s22 }
  0x28   : > { %610 = dma.done.wait (%p696_p6), %s114_s23, 512  }
  0x29   : > { %612 = vsyncadd (%p696_p6), %s114_s23, 4294966784  ;;  %v137_v0 = vld [vmem:[%s117_s24] sm:$0xff]  ;;  %v139_v1 = vld [vmem:[%s117_s24 + $0x10] sm:$0xff]  ;;  %vm182_vm0 = vcmask 31744   ;;  %v635_v8 = vmov 0.0   ;;  %s636_s17 = smov 2  }
  0x2a   : > { %v138_v2 = vld [vmem:[%s117_s24 + $0x8] sm:$0xff]  ;;  %v141_v3 = vmax.f32 %v137_v0, %v139_v1  ;;  %v140_v4 = vld [vmem:[%s117_s24 + $0x18] sm:$0xff]  ;;  %181 = vst [vmem:[#allocation2] sm:$0xff] %v635_v8  ;;  %vm194_vm9 = vcmask 1047568   ;;  %vm196_vm10 = vcmask 15360   ;;  %s637_s25 = smov 126  }
  0x2b   : > { %v142_v5 = vmax.f32 %v138_v2, %v140_v4  ;;  %183 = vst.msk [vmem:[#allocation2 + $0x8] sm:$0xff] %vm182_vm0, %v635_v8  ;;  %s638_s26 = smov 127   ;;  %s639_s27 = smov 125   ;;  %vm222_vm11 = vcmask 1039360   ;;  %vm245_vm12 = vcmask 1031168   ;;  %vm260_vm13 = vcmask 1022976  }
  0x2c   : > { %v460_v6 = vmul.f32 -1.442695, %v141_v3  ;;  %184 = vst [vmem:[#allocation2 + $0x10] sm:$0xff] %v635_v8  ;;  %s640_s28 = smov 124   ;;  %vm281_vm14 = vcmask 1014784   ;;  %vm304_vm15 = vcmask 1046528  }
  0x2d   : > { %v461_v7 = vmul.f32 -1.442695, %v142_v5  ;;  %185 = vst.msk [vmem:[#allocation2 + $0x18] sm:$0xff] %vm182_vm0, %v635_v8  ;;  %vm320_vm0 = vcmask 1045504   ;;  %s459_s29 = sshll.u32 %s738_s21, 4  ;;  %s470_s30 = sshll.u32 %s674_s10, 4 }
  0x2e   : > { %527 = vpow2.f32 %v460_v6  ;;  %288 = vst [vmem:[#allocation3] sm:$0xff] %v635_v8  ;;  %s374_s4 = scalar_lea.hbm %s797_s1, %s470_s30  ;;  %s136_s10 = scalar_lea.vmem [#allocation7], %s459_s29 }
  0x2f   : > { %529 = vpow2.f32 %v461_v7  ;;  %289 = vst [vmem:[#allocation3 + $0x8] sm:$0xff] %v635_v8  ;;  %s375_s5 = sshll.u32 %s136_s10, 4  ;;  %s377_s11 = sshll.u32 %s374_s4, 4  ;;  %s376_s5 = int_to_ptr.vmem [resolvable:$true] %s375_s5  ;;  %s378_s11 = int_to_ptr.hbm [resolvable:$true] %s377_s11 }
  0x30   : > { %290 = vst [vmem:[#allocation3 + $0x10] sm:$0xf] %v635_v8  ;;  %s363_s13 = scalar_lea.sflag [#allocation6], %s738_s21  ;;  %s579_s14 = sshra.s32 %s378_s11, 4  ;;  %s580_s14 = int_to_ptr.hbm [resolvable:$true] %s579_s14 }
  0x31   : > { %s581_s16 = scalar_lea.hbm %s580_s14, 16  ;;  %s585_s23 = scalar_lea.hbm %s797_s1, 80 }
  0x32   : > { %p582_p6 = scmp.ne.s32.totalorder %s580_s14, %s581_s16  ;;  %p586_p0 = scmp.lt.s32.totalorder %s580_s14, %s797_s1 }
  0x33   : > { %p587_p2 = scmp.lt.s32.totalorder %s585_s23, %s581_s16 }
  0x34   : > { %v528_v9 = vpop.eup %527  ;;  %p583_p12 = pnand %p582_p6, %p702_p10 }
  0x35   : > { %v530_v10 = vpop.eup %529  ;;  %v149_v11 = vadd.f32 1.0, %v528_v9  ;;  %p588_p3 = por %p587_p2, %p586_p0 }
  0x36   : > { %v150_v12 = vadd.f32 1.0, %v530_v10  ;;  %p584_p13 = pneg %p583_p12 }
  0x37   : > { %531 = vrcp.f32 %v149_v11  ;;  %v162_v16 = vand.u32 2147483648, %v149_v11  ;;  %vm156_vm1 = vweird.f32 %v149_v11  ;;  %v160_v19 = vand.u32 2147483647, %v149_v11 }
  0x38   : > { %533 = vrcp.f32 %v150_v12  ;;  %vm171_vm5 = vweird.f32 %v150_v12  ;;  %v177_v25 = vand.u32 2147483648, %v150_v12  ;;  %v175_v28 = vand.u32 2147483647, %v150_v12  ;;  %p589_p4 = pnand %p588_p3, %p584_p13 }
  0x39   : > { %v163_v22 = vor.u32 1.1754944e-38, %v162_v16  ;;  %vm161_vm4 = vcmp.eq.f32.partialorder %v160_v19, 8.507059e+37 }
  0x3a   : > { %v178_v30 = vor.u32 1.1754944e-38, %v177_v25  ;;  %vm176_vm8 = vcmp.eq.f32.partialorder %v175_v28, 8.507059e+37 }
  0x3d   : > { %v532_v13 = vpop.eup %531 }
  0x3e   : > { %v534_v14 = vpop.eup %533  ;;  %v152_v15 = vmul.f32 %v532_v13, %v149_v11  ;;  %vm157_vm2 = vweird.f32 %v532_v13 }
  0x3f   : > { %v167_v17 = vmul.f32 %v534_v14, %v150_v12  ;;  %vm158_vm3 = vmor %vm156_vm1, %vm157_vm2  ;;  %vm172_vm6 = vweird.f32 %v534_v14  ;;  %vm330_vm1 = vcmask 1044480   ;;  %vm344_vm2 = vcmask 1043456  }
  0x40   : > { %v153_v18 = vsub.f32 1.0, %v152_v15  ;;  %vm173_vm7 = vmor %vm171_vm5, %vm172_vm6 }
  0x41   : > { %v168_v20 = vsub.f32 1.0, %v167_v17 }
  0x42   : > { %v154_v21 = vmul.f32 %v532_v13, %v153_v18 }
  0x43   : > { %v169_v23 = vmul.f32 %v534_v14, %v168_v20 }
  0x44   : > { %v155_v24 = vadd.f32 %v532_v13, %v154_v21 }
  0x45   : > { %v170_v27 = vadd.f32 %v534_v14, %v169_v23 }
  0x46   : > { %v159_v26 = vsel %vm158_vm3, %v532_v13, %v155_v24 }
  0x47   : > { %v164_v29 = vsel %vm161_vm4, %v163_v22, %v159_v26  ;;  %v174_v31 = vsel %vm173_vm7, %v534_v14, %v170_v27 }
  0x48   : > { %188 = vrot.lane.b32.xlu0 %v164_v29, %s636_s17  ;;  %v179_v32 = vsel %vm176_vm8, %v178_v30, %v174_v31 }
  0x50   : > { %190 = vrot.lane.b32.xlu0 %v179_v32, %s636_s17 }
  0xba   : > { %v189_v33 = vpop.permute.xlu0 %188 }
  0xbb   : > { %195 = vst.msk [vmem:[#allocation2] sm:$0xff] %vm194_vm9, %v189_v33 }
  0xbc   : > { %197 = vst.msk [vmem:[#allocation2 + $0x8] sm:$0xff] %vm196_vm10, %v189_v33 }
  0xc2   : > { %v191_v34 = vpop.permute.xlu0 %190  ;;  %v200_v35 = vld [vmem:[#allocation2] sm:$0xff] }
  0xc3   : > { %198 = vst.msk [vmem:[#allocation2 + $0x10] sm:$0xff] %vm194_vm9, %v191_v34  ;;  %v229_v36 = vmul.f32 0.3989423, %v200_v35  ;;  %v206_v37 = vmul.f32 0.24197072, %v200_v35  ;;  %v201_v38 = vld [vmem:[#allocation2 + $0x8] sm:$0xff] }
  0xc4   : > { %199 = vst.msk [vmem:[#allocation2 + $0x18] sm:$0xff] %vm196_vm10, %v191_v34  ;;  %v207_v40 = vmul.f32 0.24197072, %v201_v38  ;;  %v230_v45 = vmul.f32 0.3989423, %v201_v38 }
  0xc5   : > { %237 = vrot.lane.b32.xlu0 %v229_v36, %s637_s25  ;;  %214 = vrot.lane.b32.xlu1 %v206_v37, %s638_s26  ;;  %v267_v47 = vmul.f32 0.053990968, %v201_v38  ;;  %v204_v48 = vmul.f32 0.053990968, %v200_v35 }
  0xca   : > { %v202_v39 = vld [vmem:[#allocation2 + $0x10] sm:$0xff] }
  0xcb   : > { %v203_v41 = vld [vmem:[#allocation2 + $0x18] sm:$0xff]  ;;  %v208_v42 = vmul.f32 0.24197072, %v202_v39  ;;  %v231_v46 = vmul.f32 0.3989423, %v202_v39 }
  0xcc   : > { %v232_v43 = vmul.f32 0.3989423, %v203_v41  ;;  %v209_v44 = vmul.f32 0.24197072, %v203_v41  ;;  %v205_v49 = vmul.f32 0.053990968, %v202_v39 }
  0xcd   : > { %216 = vrot.lane.b32.xlu1 %v207_v40, %s638_s26  ;;  %218 = vrot.lane.b32.xlu2 %v208_v42, %s638_s26  ;;  %v268_v50 = vmul.f32 0.053990968, %v203_v41 }
  0xce   : > { %243 = vrot.lane.b32.xlu0 %v232_v43, %s637_s25 }
  0xd5   : > { %239 = vrot.lane.b32.xlu1 %v230_v45, %s637_s25  ;;  %220 = vrot.lane.b32.xlu2 %v209_v44, %s638_s26 }
  0xd6   : > { %256 = vrot.lane.b32.xlu0 %v208_v42, %s639_s27 }
  0xdd   : > { %252 = vrot.lane.b32.xlu1 %v206_v37, %s639_s27  ;;  %241 = vrot.lane.b32.xlu2 %v231_v46, %s637_s25 }
  0xde   : > { %275 = vrot.lane.b32.xlu0 %v267_v47, %s640_s28 }
  0xe5   : > { %258 = vrot.lane.b32.xlu1 %v209_v44, %s639_s27  ;;  %254 = vrot.lane.b32.xlu2 %v207_v40, %s639_s27 }
  0xed   : > { %273 = vrot.lane.b32.xlu2 %v204_v48, %s640_s28  ;;  %277 = vrot.lane.b32.xlu1 %v205_v49, %s640_s28 }
  0xf5   : > { %279 = vrot.lane.b32.xlu2 %v268_v50, %s640_s28 }
 0x127   : > { %v219_v51 = vpop.permute.xlu2 %218 }
 0x12f   : > { %v221_v52 = vpop.permute.xlu2 %220 }
 0x130   : > { %v224_v10 = vsel %vm222_vm11, %v219_v51, %v221_v52 }
 0x131   : > { %v228_v12 = vadd.f32 %v224_v10, %v205_v49 }
 0x137   : > { %v215_v53 = vpop.permute.xlu1 %214  ;;  %v238_v54 = vpop.permute.xlu0 %237 }
 0x138   : > { %v242_v55 = vpop.permute.xlu2 %241 }
 0x13f   : > { %v217_v56 = vpop.permute.xlu1 %216 }
 0x140   : > { %v244_v57 = vpop.permute.xlu0 %243  ;;  %v255_v58 = vpop.permute.xlu2 %254  ;;  %v223_v61 = vsel %vm222_vm11, %v215_v53, %v217_v56 }
 0x141   : > { %v227_v63 = vadd.f32 %v223_v61, %v204_v48  ;;  %v247_v11 = vsel %vm245_vm12, %v242_v55, %v244_v57 }
 0x142   : > { %v251_v14 = vadd.f32 %v247_v11, %v228_v12 }
 0x147   : > { %v240_v59 = vpop.permute.xlu1 %239 }
 0x148   : > { %v257_v60 = vpop.permute.xlu0 %256  ;;  %v246_v62 = vsel %vm245_vm12, %v238_v54, %v240_v59  ;;  %v274_v4 = vpop.permute.xlu2 %273 }
 0x149   : > { %v250_v0 = vadd.f32 %v246_v62, %v227_v63 }
 0x14f   : > { %v253_v1 = vpop.permute.xlu1 %252 }
 0x150   : > { %v261_v2 = vsel %vm260_vm13, %v253_v1, %v255_v58  ;;  %v276_v3 = vpop.permute.xlu0 %275  ;;  %v280_v15 = vpop.permute.xlu2 %279 }
 0x151   : > { %v265_v5 = vadd.f32 %v261_v2, %v250_v0  ;;  %v282_v6 = vsel %vm281_vm14, %v274_v4, %v276_v3 }
 0x153   : > { %v286_v7 = vadd.f32 %v282_v6, %v265_v5 }
 0x155   : > { %291 = vst [vmem:[#allocation3 + $0x2] sm:$0xff] %v286_v7 }
 0x157   : > { %v259_v9 = vpop.permute.xlu1 %258 }
 0x158   : > { %v262_v13 = vsel %vm260_vm13, %v257_v60, %v259_v9 }
 0x159   : > { %v266_v16 = vadd.f32 %v262_v13, %v251_v14 }
 0x15c   : > { %v293_v20 = vld [vmem:[#allocation3] sm:$0xff] }
 0x15d   : > { %v298_v21 = vmul.f32 0.24197072, %v293_v20  ;;  %v314_v24 = vmul.f32 0.3989423, %v293_v20  ;;  %v296_v34 = vmul.f32 0.053990968, %v293_v20 }
 0x15f   : > { %v278_v17 = vpop.permute.xlu1 %277  ;;  %v305_v27 = vrot.slane %v298_v21, 1  ;;  %v321_v35 = vrot.slane %v314_v24, 2  ;;  %v331_v44 = vrot.slane %v298_v21, 3  ;;  %v345_v53 = vrot.slane %v296_v34, 4 }
 0x160   : > { %v283_v18 = vsel %vm281_vm14, %v278_v17, %v280_v15 }
 0x161   : > { %v287_v19 = vadd.f32 %v283_v18, %v266_v16 }
 0x163   : > { %292 = vst [vmem:[#allocation3 + $0xa] sm:$0xff] %v287_v19 }
 0x16a   : > { %v294_v22 = vld [vmem:[#allocation3 + $0x8] sm:$0xff]  ;;  %v295_v23 = vld [vmem:[#allocation3 + $0x10] sm:$0xf] }
 0x16b   : > { %v299_v25 = vmul.f32 0.24197072, %v294_v22  ;;  %v300_v26 = vmul.f32 0.24197072, %v295_v23  ;;  %v315_v28 = vmul.f32 0.3989423, %v294_v22 }
 0x16c   : > { %v316_v29 = vmul.f32 0.3989423, %v295_v23  ;;  %v297_v30 = vmul.f32 0.053990968, %v294_v22  ;;  %v340_v33 = vmul.f32 0.053990968, %v295_v23 }
 0x16d   : > { %v306_v31 = vrot.slane %v299_v25, 1  ;;  %v308_v32 = vrot.slane %v300_v26, 1  ;;  %v322_v36 = vrot.slane %v315_v28, 2  ;;  %v332_v40 = vrot.slane %v299_v25, 3 }
 0x16e   : > { %v324_v37 = vrot.slane %v316_v29, 2  ;;  %v334_v41 = vrot.slane %v300_v26, 3  ;;  %v346_v47 = vrot.slane %v297_v30, 4  ;;  %v348_v48 = vrot.slane %v340_v33, 4 }
 0x16f   : > { %v307_v38 = vsel %vm304_vm15, %v305_v27, %v306_v31  ;;  %v309_v39 = vsel %vm304_vm15, %v306_v31, %v308_v32  ;;  %v323_v45 = vsel %vm320_vm0, %v321_v35, %v322_v36  ;;  %v333_v51 = vsel %vm330_vm1, %v331_v44, %v332_v40 }
 0x170   : > { %v312_v42 = vadd.f32 %v307_v38, %v296_v34  ;;  %v313_v43 = vadd.f32 %v309_v39, %v297_v30  ;;  %v325_v46 = vsel %vm320_vm0, %v322_v36, %v324_v37  ;;  %v335_v52 = vsel %vm330_vm1, %v332_v40, %v334_v41 }
 0x171   : > { %v347_v56 = vsel %vm344_vm2, %v345_v53, %v346_v47  ;;  %v349_v57 = vsel %vm344_vm2, %v346_v47, %v348_v48 }
 0x172   : > { %v328_v49 = vadd.f32 %v323_v45, %v312_v42  ;;  %v329_v50 = vadd.f32 %v325_v46, %v313_v43 }
 0x174   : > { %v338_v54 = vadd.f32 %v333_v51, %v328_v49  ;;  %v339_v55 = vadd.f32 %v335_v52, %v329_v50 }
 0x176   : > { %v352_v58 = vadd.f32 %v347_v56, %v338_v54  ;;  %v353_v59 = vadd.f32 %v349_v57, %v339_v55 }
 0x178   : > { %vm354_vm3 = vcmp.gt.f32.partialorder %v352_v58, 0.01  ;;  %vm355_vm4 = vcmp.gt.f32.partialorder %v353_v59, 0.01 }
 0x179   : > { %v462_v60 = vsel %vm354_vm3, 1.0, %v635_v8  ;;  %v463_v61 = vsel %vm355_vm4, 1.0, %v635_v8 }
 0x17a   : > { %360 = vst [vmem:[%s136_s10] sm:$0xff] %v462_v60 }
 0x17b   : > { %361 = vst [vmem:[%s136_s10 + $0x8] sm:$0xff] %v463_v61 }
 0x17c   : > { %592 = shalt.err (!%p589_p4)
}
 0x17d   : > { %s641_s21 = smov 128   ;;  %s642_s25 = smov 8  }
 0x17e   : > { %473 = dma.vmem_to_hbm [thread:$0]  (%p702_p10), %s376_s5, 256, %s378_s11, %s363_s13, %s641_s21, %s641_s21, %s642_s25  }
 0x17f PF: > { %p484_p5 = scmp.ge.s32.totalorder %s631_s9, 2  ;;  %s392_s26 = sand.u32 1, %s619_s6  }
 0x180   : > { %s393_s27 = scalar_lea.sflag [#allocation6], %s392_s26 }
 0x181   : > { %p480_p7 = pnand %p484_p5, %p706_p11 }
 0x183   : > { %p481_p8 = pneg %p480_p7 }
 0x185   : > { %614 = dma.done.wait (%p481_p8), %s393_s27, 256  }
 0x186   : > { %616 = vsyncadd (%p481_p8), %s393_s27, 4294967040  ;;  %p14_p9 = scmp.ge.s32.totalorder %s678_s12, 7   ;;  %s803_s6 = smov %s623_s7 }
 0x187   : > { %s804_s7 = smov %s627_s8  ;;  %s805_s8 = smov %s690_s15 }
 0x188   : > { %s806_s9 = smov %s678_s12  ;;  %16 = sbr.rel (!%p14_p9) target bundleno = 5 (0x5), region = 69 }
 0x18d   :  { %399 = vsyncpa [#allocation5], 1 }
 0x18e   :  { %401 = vsyncpa [#allocation5 + $0x1], 1 }
 0x18f   :  { %402 = vsyncpa [#allocation6], 1 }
 0x190   :  { %404 = vsyncpa [#allocation6 + $0x1], 1 }

</bundles_post_ra>
